<compile_context>
chip_gen: v5e
topology: v5e:2x2
jax: 0.10.0
libtpu: 0.0.40
codegen_flags: <defaults>
</compile_context>

<pallas_src>
import functools

import jax
import jax.numpy as jnp
from jax.experimental import pallas as pl
from jax.experimental.pallas import tpu as pltpu


def _round_up(x, m):
    return ((x + m - 1) // m) * m


def _vmem_budget_bytes():
    """~75% of physical VMEM per core; conservative 48 MiB fallback."""
    try:
        cap = int(pltpu.get_tpu_info().vmem_capacity_bytes)
    except Exception:
        cap = 64 * 1024 * 1024
    return (cap * 3) // 4


def _pick_tm(M, tm_max):
    """Row-tile size: multiple of 8, <=12.5% padding waste, >=2 tiles for big M."""
    tm = min(tm_max, _round_up(M, 8))
    while tm > 64 and (_round_up(M, tm) - M) * 8 > M:
        tm = max(64, _round_up(tm // 2, 8))
    # Give the v7x megacore at least two row tiles to shard across (neutral
    # on single-TC chips).
    if M >= 256 and _round_up(M, tm) // tm < 2:
        tm = max(64, _round_up((tm + 1) // 2, 8))
    return tm


def _pick_th(H_pad, th_max):
    """Largest multiple-of-128 divisor of H_pad that is <= th_max."""
    if H_pad <= th_max:
        return H_pad
    q = H_pad // 128
    for d in range(th_max // 128, 0, -1):
        if q % d == 0:
            return 128 * d
    return 128


# ----------------------------------------------------------------------------
# Kernels
# ----------------------------------------------------------------------------

def _ffn_resident_kernel(x_ref, w1_ref, b1_ref, w2_ref, b2_ref, o_ref):
    # Weights are fully resident in VMEM (constant index_map); one grid axis
    # streams row tiles of x.
    wdt = w1_ref.dtype
    h = jnp.dot(x_ref[...].astype(wdt), w1_ref[...],
                preferred_element_type=jnp.float32)
    h = jnp.maximum(h + b1_ref[...].astype(jnp.float32), 0.0)
    acc = jnp.dot(h.astype(wdt), w2_ref[...],
                  preferred_element_type=jnp.float32)
    o_ref[...] = (acc + b2_ref[...].astype(jnp.float32)).astype(o_ref.dtype)


def _ffn_slab_kernel(x_ref, w1_ref, b1_ref, w2_ref, b2_ref, o_ref, acc_ref):
    # x_ref : (tm, Cp)   row tile of flattened tokens
    # w1_ref: (Cp, th)   hidden-slab of first projection
    # b1_ref: (1, th)
    # w2_ref: (th, Cp)   hidden-slab of second projection
    # b2_ref: (1, Cp)
    # o_ref : (tm, Cp)   output tile (resident across the reduction axis)
    # acc_ref: (tm, Cp)  f32 accumulator scratch
    k = pl.program_id(1)
    wdt = w1_ref.dtype

    h = jnp.dot(x_ref[...].astype(wdt), w1_ref[...],
                preferred_element_type=jnp.float32)
    h = jnp.maximum(h + b1_ref[...].astype(jnp.float32), 0.0)
    contrib = jnp.dot(h.astype(wdt), w2_ref[...],
                      preferred_element_type=jnp.float32)

    @pl.when(k == 0)
    def _first():
        acc_ref[...] = contrib          # no zero-fill + add

    @pl.when(k != 0)
    def _accum():
        acc_ref[...] += contrib

    @pl.when(k == pl.num_programs(1) - 1)
    def _finalize():
        o_ref[...] = (acc_ref[...] + b2_ref[...].astype(jnp.float32)
                      ).astype(o_ref.dtype)


# ----------------------------------------------------------------------------
# Wrappers
# ----------------------------------------------------------------------------

def prepare_params(w1, b1, w2, b2):
    """Pad weights once (outside the hot path) to lane-dense (x128) shapes.

    Zero padding is exact under matmul / ReLU: padded hidden columns produce
    relu(0) = 0 and padded W2 rows contribute nothing.
    """
    C, H = w1.shape
    C_pad = _round_up(C, 128)
    H_pad = _round_up(H, 128)
    if (C_pad, H_pad) != (C, H):
        w1 = jnp.pad(w1, ((0, C_pad - C), (0, H_pad - H)))
        w2 = jnp.pad(w2, ((0, H_pad - H), (0, C_pad - C)))
    b1 = jnp.pad(b1, (0, H_pad - H)).reshape(1, H_pad)
    b2 = jnp.pad(b2, (0, C_pad - C)).reshape(1, C_pad)
    return (w1, b1, w2, b2)


@functools.partial(jax.jit, static_argnames=("tm_max", "th_max"))
def feed_forward(x, params, *, tm_max=512, th_max=1024):
    """x: (B, T, C) -> (B, T, C). params = prepare_params(w1, b1, w2, b2)."""
    w1p, b1p, w2p, b2p = params
    B, T, C = x.shape
    C_pad, H_pad = w1p.shape
    assert C_pad % 128 == 0 and H_pad % 128 == 0, "use prepare_params()"
    assert C <= C_pad
    M = B * T

    budget = _vmem_budget_bytes()
    xb = x.dtype.itemsize
    wb = w1p.dtype.itemsize
    ob = x.dtype.itemsize

    tm = _pick_tm(M, tm_max)
    M_pad = _round_up(M, tm)

    # ---- per-call activation padding only (weights are pre-padded) ----
    x2d = x.reshape(M, C)
    if M_pad != M or C_pad != C:
        x2d = jnp.pad(x2d, ((0, M_pad - M), (0, C_pad - C)))

    # ---- path selection: keep W1/W2 fully VMEM-resident when they fit ----
    weight_bytes = (2 * C_pad * H_pad + H_pad + C_pad) * wb
    resident = weight_bytes <= budget // 3

    if resident:
        def est_res(tm_):
            return (2 * weight_bytes                 # weights (conservative 2x)
                    + 2 * tm_ * C_pad * xb           # x tiles (double-buffered)
                    + 2 * tm_ * C_pad * ob           # out tiles
                    + tm_ * H_pad * 4                # h intermediate (f32)
                    + tm_ * C_pad * 4)               # dot result (f32)
        while est_res(tm) > budget and tm > 64:
            tm = max(64, _round_up(tm // 2, 8))
        if est_res(tm) > budget:
            resident = False
        else:
            M_pad = _round_up(M, tm)
            if x2d.shape[0] != M_pad:
                x2d = jnp.pad(x2d, ((0, M_pad - x2d.shape[0]), (0, 0)))
            vmem_limit = int(min(budget,
                                 max(32 * 1024 * 1024, int(est_res(tm) * 1.3))))
            out2d = pl.pallas_call(
                _ffn_resident_kernel,
                out_shape=jax.ShapeDtypeStruct((M_pad, C_pad), x.dtype),
                grid_spec=pltpu.PrefetchScalarGridSpec(
                    num_scalar_prefetch=0,
                    grid=(M_pad // tm,),
                    in_specs=[
                        pl.BlockSpec((tm, C_pad),     lambda i: (i, 0)),  # x rows
                        pl.BlockSpec((C_pad, H_pad),  lambda i: (0, 0)),  # W1 (resident)
                        pl.BlockSpec((1, H_pad),      lambda i: (0, 0)),  # b1
                        pl.BlockSpec((H_pad, C_pad),  lambda i: (0, 0)),  # W2 (resident)
                        pl.BlockSpec((1, C_pad),      lambda i: (0, 0)),  # b2
                    ],
                    out_specs=pl.BlockSpec((tm, C_pad), lambda i: (i, 0)),
                ),
                compiler_params=pltpu.CompilerParams(
                    dimension_semantics=("parallel",),
                    vmem_limit_bytes=vmem_limit,
                ),
            )(x2d, w1p, b1p, w2p, b2p)
            return out2d[:M, :C].reshape(B, T, C)

    # ---- fallback: tile the hidden dimension as a reduction axis ----
    th = _pick_th(H_pad, th_max)

    def est_slab(tm_, th_):
        return (2 * tm_ * C_pad * xb                 # x tiles
                + 2 * (C_pad * th_ + th_) * wb       # W1 / b1 slabs
                + 2 * (th_ * C_pad + C_pad) * wb     # W2 / b2 slabs
                + 2 * tm_ * C_pad * ob               # out tiles
                + tm_ * C_pad * 4                    # f32 accumulator
                + tm_ * th_ * 4)                     # h intermediate

    while est_slab(tm, th) > budget and (th > 128 or tm > 64):
        if th > 128:
            th = _pick_th(H_pad, max(128, th // 2))
        else:
            tm = max(64, _round_up(tm // 2, 8))
    M_pad = _round_up(M, tm)
    if x2d.shape[0] != M_pad:
        x2d = jnp.pad(x2d, ((0, M_pad - x2d.shape[0]), (0, 0)))

    vmem_limit = int(min(budget,
                         max(32 * 1024 * 1024, int(est_slab(tm, th) * 1.3))))

    out2d = pl.pallas_call(
        _ffn_slab_kernel,
        out_shape=jax.ShapeDtypeStruct((M_pad, C_pad), x.dtype),
        grid_spec=pltpu.PrefetchScalarGridSpec(
            num_scalar_prefetch=0,
            grid=(M_pad // tm, H_pad // th),
            in_specs=[
                pl.BlockSpec((tm, C_pad), lambda i, k: (i, 0)),   # x rows
                pl.BlockSpec((C_pad, th), lambda i, k: (0, k)),   # W1 H-slab
                pl.BlockSpec((1, th),     lambda i, k: (0, k)),   # b1 H-slab
                pl.BlockSpec((th, C_pad), lambda i, k: (k, 0)),   # W2 H-slab
                pl.BlockSpec((1, C_pad),  lambda i, k: (0, 0)),   # b2
            ],
            out_specs=pl.BlockSpec((tm, C_pad), lambda i, k: (i, 0)),
            scratch_shapes=[pltpu.VMEM((tm, C_pad), jnp.float32)],
        ),
        compiler_params=pltpu.CompilerParams(
            dimension_semantics=("parallel", "arbitrary"),
            vmem_limit_bytes=vmem_limit,
        ),
    )(x2d, w1p, b1p, w2p, b2p)

    return out2d[:M, :C].reshape(B, T, C)


def init_params(key, n_embd, dtype=jnp.float32):
    """Deterministic init mimicking nn.Linear's uniform(-1/sqrt(fan_in), +...)."""
    k1, k2, k3, k4 = jax.random.split(key, 4)
    hidden = 4 * n_embd
    bound1 = 1.0 / jnp.sqrt(n_embd)
    bound2 = 1.0 / jnp.sqrt(hidden)
    w1 = jax.random.uniform(k1, (n_embd, hidden), dtype, -bound1, bound1)
    b1 = jax.random.uniform(k2, (hidden,), dtype, -bound1, bound1)
    w2 = jax.random.uniform(k3, (hidden, n_embd), dtype, -bound2, bound2)
    b2 = jax.random.uniform(k4, (n_embd,), dtype, -bound2, bound2)
    return w1, b1, w2, b2


if __name__ == "__main__":
    key = jax.random.PRNGKey(0)
    kx, kp = jax.random.split(key)

    B, T, n_embd = 2, 8, 32  # small smoke-test shapes; hidden = 4*n_embd = 128
    x = jax.random.normal(kx, (B, T, n_embd), dtype=jnp.float32)
    w1, b1, w2, b2 = init_params(kp, n_embd)

    params = prepare_params(w1, b1, w2, b2)   # pad weights once, outside hot path
    out = feed_forward(x, params)
    out = jax.block_until_ready(out)

    # Reference check in plain JAX (eval-mode dropout == identity).
    ref = jnp.maximum(x.reshape(-1, n_embd) @ w1 + b1, 0.0) @ w2 + b2
    ref = ref.reshape(B, T, n_embd)
    assert out.shape == (B, T, n_embd)
    assert jnp.allclose(out, ref, atol=1e-5, rtol=1e-5)

    print("KERNEL_OK")
</pallas_src>

<mosaic_0001>
module attributes {stable_mosaic.version = 11 : i64} {
  func.func @_ffn_resident_kernel(%arg0: i32, %arg1: memref<16x128xf32, #tpu.memory_space<vmem>>, %arg2: memref<128x128xf32, #tpu.memory_space<vmem>>, %arg3: memref<1x128xf32, #tpu.memory_space<vmem>>, %arg4: memref<128x128xf32, #tpu.memory_space<vmem>>, %arg5: memref<1x128xf32, #tpu.memory_space<vmem>>, %arg6: memref<16x128xf32, #tpu.memory_space<vmem>>) attributes {dimension_semantics = [#tpu.dimension_semantics<parallel>], iteration_bounds = array<i64: 1>, scalar_prefetch = 0 : i64, scratch_operands = 0 : i64, tpu.core_type = #tpu.core_type<tc>, window_params = [{transform_indices = @transform_0, window_bounds = array<i64: 16, 128>}, {pipeline_mode = #tpu.pipeline_mode<synchronous>, transform_indices = @transform_1, window_bounds = array<i64: 128, 128>}, {pipeline_mode = #tpu.pipeline_mode<synchronous>, transform_indices = @transform_2, window_bounds = array<i64: 1, 128>}, {pipeline_mode = #tpu.pipeline_mode<synchronous>, transform_indices = @transform_3, window_bounds = array<i64: 128, 128>}, {pipeline_mode = #tpu.pipeline_mode<synchronous>, transform_indices = @transform_4, window_bounds = array<i64: 1, 128>}, {transform_indices = @transform_5, window_bounds = array<i64: 16, 128>}]} {
    %c0 = arith.constant 0 : index
    %c0_0 = arith.constant 0 : index
    %0 = vector.load %arg1[%c0, %c0_0] : memref<16x128xf32, #tpu.memory_space<vmem>>, vector<16x128xf32>
    %c0_1 = arith.constant 0 : index
    %c0_2 = arith.constant 0 : index
    %1 = vector.load %arg2[%c0_1, %c0_2] : memref<128x128xf32, #tpu.memory_space<vmem>>, vector<128x128xf32>
    %cst = arith.constant dense<0.000000e+00> : vector<16x128xf32>
    %2 = tpu.matmul %0, %1, %cst {dimension_numbers = #tpu.dot_dimension_numbers<[1], [0], [0], [1], [0, 0, 1, 1], [], []>} : vector<16x128xf32>, vector<128x128xf32>, vector<16x128xf32> -> vector<16x128xf32>
    %c0_3 = arith.constant 0 : index
    %c0_4 = arith.constant 0 : index
    %3 = vector.load %arg3[%c0_3, %c0_4] : memref<1x128xf32, #tpu.memory_space<vmem>>, vector<1x128xf32>
    %4 = vector.broadcast %3 : vector<1x128xf32> to vector<16x128xf32>
    %5 = arith.addf %2, %4 : vector<16x128xf32>
    %cst_5 = arith.constant 0.000000e+00 : f32
    %6 = vector.broadcast %cst_5 : f32 to vector<16x128xf32>
    %7 = arith.maximumf %5, %6 : vector<16x128xf32>
    %c0_6 = arith.constant 0 : index
    %c0_7 = arith.constant 0 : index
    %8 = vector.load %arg4[%c0_6, %c0_7] : memref<128x128xf32, #tpu.memory_space<vmem>>, vector<128x128xf32>
    %cst_8 = arith.constant dense<0.000000e+00> : vector<16x128xf32>
    %9 = tpu.matmul %7, %8, %cst_8 {dimension_numbers = #tpu.dot_dimension_numbers<[1], [0], [0], [1], [0, 0, 1, 1], [], []>} : vector<16x128xf32>, vector<128x128xf32>, vector<16x128xf32> -> vector<16x128xf32>
    %c0_9 = arith.constant 0 : index
    %c0_10 = arith.constant 0 : index
    %10 = vector.load %arg5[%c0_9, %c0_10] : memref<1x128xf32, #tpu.memory_space<vmem>>, vector<1x128xf32>
    %11 = vector.broadcast %10 : vector<1x128xf32> to vector<16x128xf32>
    %12 = arith.addf %9, %11 : vector<16x128xf32>
    %c0_11 = arith.constant 0 : index
    %c0_12 = arith.constant 0 : index
    %13 = vector.load %arg6[%c0_11, %c0_12] : memref<16x128xf32, #tpu.memory_space<vmem>>, vector<16x128xf32>
    tpu.vector_store %arg6[%c0_11, %c0_12], %12 {strides = array<i32>} : memref<16x128xf32, #tpu.memory_space<vmem>>, vector<16x128xf32>,
    return
  }
  func.func @transform_0(%arg0: i32) -> (i32, i32) {
    %c0_i32 = arith.constant 0 : i32
    %c0_i32_0 = arith.constant 0 : i32
    return %arg0, %c0_i32 : i32, i32
  }
  func.func @transform_1(%arg0: i32) -> (i32, i32) {
    %c0_i32 = arith.constant 0 : i32
    %c0_i32_0 = arith.constant 0 : i32
    %c0_i32_1 = arith.constant 0 : i32
    return %c0_i32, %c0_i32_0 : i32, i32
  }
  func.func @transform_2(%arg0: i32) -> (i32, i32) {
    %c0_i32 = arith.constant 0 : i32
    %c0_i32_0 = arith.constant 0 : i32
    %c0_i32_1 = arith.constant 0 : i32
    return %c0_i32, %c0_i32_0 : i32, i32
  }
  func.func @transform_3(%arg0: i32) -> (i32, i32) {
    %c0_i32 = arith.constant 0 : i32
    %c0_i32_0 = arith.constant 0 : i32
    %c0_i32_1 = arith.constant 0 : i32
    return %c0_i32, %c0_i32_0 : i32, i32
  }
  func.func @transform_4(%arg0: i32) -> (i32, i32) {
    %c0_i32 = arith.constant 0 : i32
    %c0_i32_0 = arith.constant 0 : i32
    %c0_i32_1 = arith.constant 0 : i32
    return %c0_i32, %c0_i32_0 : i32, i32
  }
  func.func @transform_5(%arg0: i32) -> (i32, i32) {
    %c0_i32 = arith.constant 0 : i32
    %c0_i32_0 = arith.constant 0 : i32
    return %arg0, %c0_i32 : i32, i32
  }
}

</mosaic_0001>

<bundles_post_ra>
// kernel: feed_forward.1
= control target key start
LH: loop header
LB: loop body
LE: loop exit
PB: predicated region body
PF: predicated region fallthrough
CT: control target
= control target key end

     0   :  { %10 = vsyncpa [#allocation3], 0  ;;  %s298_s0 = inlined_call_operand.vmem [shape: f32[16,128], index: 0, kind: input, shape index: {}]   ;;  %s299_s1 = inlined_call_operand.hbm [shape: f32[128,128], index: 1, kind: input, shape index: {}]   ;;  %s300_s2 = inlined_call_operand.vmem [shape: f32[1,128], index: 2, kind: input, shape index: {}]   ;;  %s301_s3 = inlined_call_operand.hbm [shape: f32[128,128], index: 3, kind: input, shape index: {}]   ;;  %s302_s4 = inlined_call_operand.vmem [shape: f32[1,128], index: 4, kind: input, shape index: {}]   ;;  %s303_s5 = inlined_call_operand.vmem [shape: f32[16,128], index: 5, kind: output, shape index: {}]  }
   0x1   :  { %s18_s20 = sshll.u32 %s299_s1, 4  ;;  %s19_s20 = int_to_ptr.hbm [resolvable:$true] %s18_s20 }
   0x2   :  { %11 = vsyncpa [#allocation5], 0  ;;  %s240_s21 = smov [#allocation2]   ;;  %s33_s25 = sshll.u32 %s301_s3, 4  ;;  %s34_s25 = int_to_ptr.hbm [resolvable:$true] %s33_s25 }
   0x3   :  { %s20_s22 = sshll.u32 %s240_s21, 4  ;;  %s241_s26 = smov 128   ;;  %s21_s22 = int_to_ptr.vmem [resolvable:$true] %s20_s22 }
   0x4   :  { %s242_s27 = smov 8   ;;  %s243_s28 = smov [#allocation4]  }
   0x5   :  { %26 = dma.hbm_to_vmem [thread:$0]  %s19_s20, 2048, %s21_s22, [#allocation3], %s241_s26, %s241_s26, %s242_s27  }
   0x6   :  { %s35_s29 = sshll.u32 %s243_s28, 4  ;;  %s36_s29 = int_to_ptr.vmem [resolvable:$true] %s35_s29 }
   0x7   :  { %41 = dma.hbm_to_vmem [thread:$0]  %s34_s25, 2048, %s36_s29, [#allocation5], %s241_s26, %s241_s26, %s242_s27  }
   0x8   :  { %236 = dma.done.wait [#allocation3], 2048  }
   0x9   :  { %237 = vsyncadd [#allocation3], 4294965248 }
   0xa   :  { %238 = dma.done.wait [#allocation5], 2048  }
   0xb   :  { %239 = vsyncadd [#allocation5], 4294965248  ;;  %v69_v0 = vld [vmem:[#allocation2 + $0x78] sm:$0xff]  ;;  %v68_v1 = vld [vmem:[#allocation2 + $0x70] sm:$0xff] }
   0xc   :  { %150 = vmatpush.msra.mxu2 %v69_v0  ;;  %74 = vmatpush.msra.mxu0 %v69_v0  ;;  %v67_v2 = vld [vmem:[#allocation2 + $0x68] sm:$0xff]  ;;  %v66_v3 = vld [vmem:[#allocation2 + $0x60] sm:$0xff]  ;;  %v65_v4 = vld [vmem:[#allocation2 + $0x58] sm:$0xff] }
   0xd   :  { %v114_v5 = vld [vmem:[#allocation4 + $0x78] sm:$0xff]  ;;  %v113_v6 = vld [vmem:[#allocation4 + $0x70] sm:$0xff]  ;;  %v112_v8 = vld [vmem:[#allocation4 + $0x68] sm:$0xff] }
   0xe   :  { %151 = vmatpush.msra.mxu2 %v68_v1  ;;  %75 = vmatpush.msra.mxu0 %v68_v1  ;;  %v64_v7 = vld [vmem:[#allocation2 + $0x50] sm:$0xff]  ;;  %v63_v9 = vld [vmem:[#allocation2 + $0x48] sm:$0xff]  ;;  %v111_v10 = vld [vmem:[#allocation4 + $0x60] sm:$0xff] }
   0xf   :  { %166 = vmatpush.msra.mxu3 %v114_v5  ;;  %119 = vmatpush.msra.mxu1 %v114_v5  ;;  %v62_v11 = vld [vmem:[#allocation2 + $0x40] sm:$0xff]  ;;  %v110_v12 = vld [vmem:[#allocation4 + $0x58] sm:$0xff]  ;;  %v109_v14 = vld [vmem:[#allocation4 + $0x50] sm:$0xff] }
  0x10   :  { %152 = vmatpush.msra.mxu2 %v67_v2  ;;  %76 = vmatpush.msra.mxu0 %v67_v2  ;;  %v61_v13 = vld [vmem:[#allocation2 + $0x38] sm:$0xff]  ;;  %v60_v15 = vld [vmem:[#allocation2 + $0x30] sm:$0xff]  ;;  %v108_v16 = vld [vmem:[#allocation4 + $0x48] sm:$0xff] }
  0x11   :  { %167 = vmatpush.msra.mxu3 %v113_v6  ;;  %120 = vmatpush.msra.mxu1 %v113_v6  ;;  %v59_v17 = vld [vmem:[#allocation2 + $0x28] sm:$0xff]  ;;  %v107_v18 = vld [vmem:[#allocation4 + $0x40] sm:$0xff]  ;;  %v106_v20 = vld [vmem:[#allocation4 + $0x38] sm:$0xff] }
  0x12   :  { %153 = vmatpush.msra.mxu2 %v66_v3  ;;  %77 = vmatpush.msra.mxu0 %v66_v3  ;;  %v58_v19 = vld [vmem:[#allocation2 + $0x20] sm:$0xff]  ;;  %v57_v21 = vld [vmem:[#allocation2 + $0x18] sm:$0xff]  ;;  %v105_v22 = vld [vmem:[#allocation4 + $0x30] sm:$0xff] }
  0x13   :  { %168 = vmatpush.msra.mxu3 %v112_v8  ;;  %121 = vmatpush.msra.mxu1 %v112_v8  ;;  %v56_v23 = vld [vmem:[#allocation2 + $0x10] sm:$0xff]  ;;  %v104_v24 = vld [vmem:[#allocation4 + $0x28] sm:$0xff]  ;;  %v103_v26 = vld [vmem:[#allocation4 + $0x20] sm:$0xff] }
  0x14   :  { %154 = vmatpush.msra.mxu2 %v65_v4  ;;  %78 = vmatpush.msra.mxu0 %v65_v4  ;;  %v55_v25 = vld [vmem:[#allocation2 + $0x8] sm:$0xff]  ;;  %v54_v27 = vld [vmem:[#allocation2] sm:$0xff]  ;;  %v102_v30 = vld [vmem:[#allocation4 + $0x18] sm:$0xff] }
  0x15   :  { %169 = vmatpush.msra.mxu3 %v111_v10  ;;  %122 = vmatpush.msra.mxu1 %v111_v10  ;;  %v53_v28 = vld [vmem:[%s298_s0 + $0x8] sm:$0xff]  ;;  %v52_v29 = vld [vmem:[%s298_s0] sm:$0xff]  ;;  %v101_v31 = vld [vmem:[#allocation4 + $0x10] sm:$0xff] }
  0x16   :  { %155 = vmatpush.msra.mxu2 %v64_v7  ;;  %79 = vmatpush.msra.mxu0 %v64_v7  ;;  %v100_v32 = vld [vmem:[#allocation4 + $0x8] sm:$0xff]  ;;  %v99_v33 = vld [vmem:[#allocation4] sm:$0xff] }
  0x17   :  { %170 = vmatpush.msra.mxu3 %v110_v12  ;;  %123 = vmatpush.msra.mxu1 %v110_v12  ;;  %v186_v34 = vld [vmem:[%s300_s2] ss:$0 sm:$0xff] }
  0x18   :  { %156 = vmatpush.msra.mxu2 %v63_v9  ;;  %80 = vmatpush.msra.mxu0 %v63_v9  ;;  %v187_v41 = vld [vmem:[%s302_s4] ss:$0 sm:$0xff] }
  0x19   :  { %171 = vmatpush.msra.mxu3 %v109_v14  ;;  %124 = vmatpush.msra.mxu1 %v109_v14 }
  0x1a   :  { %157 = vmatpush.msra.mxu2 %v62_v11  ;;  %81 = vmatpush.msra.mxu0 %v62_v11 }
  0x1b   :  { %172 = vmatpush.msra.mxu3 %v108_v16  ;;  %125 = vmatpush.msra.mxu1 %v108_v16 }
  0x1c   :  { %158 = vmatpush.msra.mxu2 %v61_v13  ;;  %82 = vmatpush.msra.mxu0 %v61_v13 }
  0x1d   :  { %173 = vmatpush.msra.mxu3 %v107_v18  ;;  %126 = vmatpush.msra.mxu1 %v107_v18 }
  0x1e   :  { %159 = vmatpush.msra.mxu2 %v60_v15  ;;  %83 = vmatpush.msra.mxu0 %v60_v15 }
  0x1f   :  { %174 = vmatpush.msra.mxu3 %v106_v20  ;;  %127 = vmatpush.msra.mxu1 %v106_v20 }
  0x20   :  { %160 = vmatpush.msra.mxu2 %v59_v17  ;;  %84 = vmatpush.msra.mxu0 %v59_v17 }
  0x21   :  { %175 = vmatpush.msra.mxu3 %v105_v22  ;;  %128 = vmatpush.msra.mxu1 %v105_v22 }
  0x22   :  { %161 = vmatpush.msra.mxu2 %v58_v19  ;;  %85 = vmatpush.msra.mxu0 %v58_v19 }
  0x23   :  { %176 = vmatpush.msra.mxu3 %v104_v24  ;;  %129 = vmatpush.msra.mxu1 %v104_v24 }
  0x24   :  { %162 = vmatpush.msra.mxu2 %v57_v21  ;;  %86 = vmatpush.msra.mxu0 %v57_v21 }
  0x25   :  { %177 = vmatpush.msra.mxu3 %v103_v26  ;;  %130 = vmatpush.msra.mxu1 %v103_v26 }
  0x26   :  { %163 = vmatpush.msra.mxu2 %v56_v23  ;;  %87 = vmatpush.msra.mxu0 %v56_v23 }
  0x27   :  { %178 = vmatpush.msra.mxu3 %v102_v30  ;;  %131 = vmatpush.msra.mxu1 %v102_v30 }
  0x28   :  { %164 = vmatpush.msra.mxu2 %v55_v25  ;;  %88 = vmatpush.msra.mxu0 %v55_v25 }
  0x29   :  { %179 = vmatpush.msra.mxu3 %v101_v31  ;;  %132 = vmatpush.msra.mxu1 %v101_v31 }
  0x2a   :  { %165 = vmatpush.msra.mxu2 %v54_v27  ;;  %89 = vmatpush.msra.mxu0 %v54_v27 }
  0x2b   :  { %93 = vmatmul.f32.vlgmr.msra.gmra.mxu2 %v53_v28  ;;  %90 = vmatmul.f32.vlgmr.msra.gmra.mxu0 %v52_v29 }
  0x2c   :  { %180 = vmatpush.msra.mxu3 %v100_v32  ;;  %133 = vmatpush.msra.mxu1 %v100_v32 }
  0x2e   :  { %181 = vmatpush.msra.mxu3 %v99_v33  ;;  %134 = vmatpush.msra.mxu1 %v99_v33 }
  0xa8   :  { %v91_v35 = vpop.f32.mrf.mxu0 }
  0xa9   :  { %v92_v36 = vadd.f32 %v186_v34, %v91_v35 }
  0xab   :  { %v97_v37 = vmax.f32 %v92_v36, 0.0 }
  0xad   :  { %135 = vmatmul.f32.vlgmr.msra.gmra.mxu1 %v97_v37 }
  0xae   :  { %v94_v38 = vpop.f32.mrf.mxu2 }
  0xaf   :  { %v95_v39 = vadd.f32 %v186_v34, %v94_v38 }
  0xb1   :  { %v98_v40 = vmax.f32 %v95_v39, 0.0 }
  0xb3   :  { %138 = vmatmul.f32.vlgmr.msra.gmra.mxu3 %v98_v40 }
 0x12a   :  { %v136_v42 = vpop.f32.mrf.mxu1 }
 0x12b   :  { %v137_v43 = vadd.f32 %v187_v41, %v136_v42 }
 0x12d   :  { %142 = vst [vmem:[%s303_s5] sm:$0xff] %v137_v43 }
 0x136   :  { %v139_v44 = vpop.f32.mrf.mxu3 }
 0x137   :  { %v140_v45 = vadd.f32 %v187_v41, %v139_v44 }
 0x139   :  { %143 = vst [vmem:[%s303_s5 + $0x8] sm:$0xff] %v140_v45 }
 0x13a   :  { %148 = vsyncpa [#allocation3], 1 }
 0x13b   :  { %149 = vsyncpa [#allocation5], 1 }

</bundles_post_ra>
